<compile_context>
chip_gen: v5e
topology: v5e:2x2
jax: 0.10.0
libtpu: 0.0.40
codegen_flags: <defaults>
</compile_context>

<pallas_src>
import jax
import jax.numpy as jnp
import numpy as np
from jax import lax
from jax.experimental import pallas as pl
from jax.experimental.pallas import tpu as pltpu

LEAKY_SLOPE = 0.01          # torch.nn.LeakyReLU default negative_slope
_LANE = 128                 # TPU lane width -> padded feature width
_TE = 64                    # sorted-edge rows processed per chunk
_SUB = 8                    # destination rows per mask group (one sublane tile)
_MAX_DST_TILE = 256         # destination rows per conv grid step
_LIN_TILE = 512             # row tile for the embedding linear kernel
_BIG = 3.0e38               # "+inf" sentinel for the segment min
_BIG_THRESH = 1.0e38        # anything below this was actually written


def _round_up(x, m):
    return (x + m - 1) // m * m


def _dst_tile(n):
    """Destination rows per conv grid step (multiple of 8, capped at 256)."""
    return min(_MAX_DST_TILE, _round_up(max(n, 1), _SUB))


_VMEM_LIMIT_CACHE = [None]


def _vmem_limit_bytes():
    """Chip-aware VMEM budget (~3/4 of physical; 110 MiB hard cap)."""
    if _VMEM_LIMIT_CACHE[0] is None:
        cap = 64 * 1024 * 1024                      # conservative (v7x) fallback
        try:
            info = pltpu.get_tpu_info()
            cap = int(getattr(info, "vmem_capacity_bytes", cap) or cap)
        except Exception:
            pass
        _VMEM_LIMIT_CACHE[0] = int(min(cap * 3 // 4, 110 * 1024 * 1024))
    return _VMEM_LIMIT_CACHE[0]


# ---------------------------------------------------------------------------
# Kernel 1: LinearBlock(in, out)  ==  LeakyReLU(x @ W + b)   (row-tiled)
# ---------------------------------------------------------------------------
def _linear_leaky_kernel(x_ref, w_ref, b_ref, o_ref):
    h = jnp.dot(x_ref[...], w_ref[...], preferred_element_type=jnp.float32)
    h = h + b_ref[...]
    o_ref[...] = jnp.where(h > 0, h, LEAKY_SLOPE * h)


def linear_leaky(x, w_pad, b_pad):
    n, din = x.shape
    wp = w_pad.shape[1]
    tile = min(_LIN_TILE, _round_up(max(n, 1), _SUB))
    n_pad = _round_up(n, tile)
    x_p = jnp.pad(x, ((0, n_pad - n), (0, 0))) if n_pad != n else x
    out = pl.pallas_call(
        _linear_leaky_kernel,
        out_shape=jax.ShapeDtypeStruct((n_pad, wp), jnp.float32),
        grid=(n_pad // tile,),
        in_specs=[
            pl.BlockSpec((tile, din), lambda i: (i, 0)),
            pl.BlockSpec((din, wp), lambda i: (0, 0)),
            pl.BlockSpec((1, wp), lambda i: (0, 0)),
        ],
        out_specs=pl.BlockSpec((tile, wp), lambda i: (i, 0)),
        compiler_params=pltpu.CompilerParams(
            dimension_semantics=("parallel",),
            vmem_limit_bytes=_vmem_limit_bytes()),
    )(x_p, w_pad, b_pad)
    return out[:n] if n_pad != n else out


# ---------------------------------------------------------------------------
# Kernel 2: BipartiteResMRConv (destination-block grid, pre-gathered sources)
#
#   maxes = scatter_max(x_dst[e1] - x_src[e0], e1)   (empty segments -> 0)
#         = x_dst - segment_min(gathered)            (on non-empty segments)
#   out   = x_dst + LeakyReLU(x_dst @ W1 + maxes @ W2 + b)
#
# `gathered` = x_src[e0_sorted] is computed on the JAX side; edges are sorted
# by destination and seg_ref[d] (SMEM, scalar prefetch) is the first sorted
# edge index of destination d.  Per sub-group of 8 destination rows the
# segment mins are carried in an (8,128) register tile and written once with
# an aligned store.
# ---------------------------------------------------------------------------
def _conv_kernel(seg_ref, g_ref, x_dst_ref, w1_ref, w2_ref, b_ref, o_ref,
                 maxes_ref):
    td, wp = maxes_ref.shape
    d0 = pl.program_id(0) * td
    # hoisted loop-invariant iota (JAX does not CSE broadcast_in_dim)
    e_iota = lax.broadcasted_iota(jnp.int32, (_TE, 1), 0)

    def sub_body(sb, carry):
        row0 = pl.multiple_of(sb * _SUB, _SUB)
        d_base = d0 + sb * _SUB
        bounds = [seg_ref[d_base + r] for r in range(_SUB + 1)]
        lo = bounds[0]
        hi = bounds[_SUB]
        n_chunks = (hi - lo + (_TE - 1)) // _TE

        def chunk_body(c, acc):
            start = lo + c * _TE
            g = g_ref[pl.ds(start, _TE), :]        # (TE, wp) gathered src rows
            gidx = e_iota + start                  # (TE, 1) sorted-edge ids
            rows = []
            for r in range(_SUB):
                m = jnp.logical_and(gidx >= bounds[r], gidx < bounds[r + 1])
                rows.append(jnp.min(jnp.where(m, g, _BIG),
                                    axis=0, keepdims=True))
            return jnp.minimum(acc, jnp.concatenate(rows, axis=0))

        seg_min = lax.fori_loop(
            0, n_chunks, chunk_body,
            jnp.full((_SUB, wp), _BIG, dtype=jnp.float32))

        x_dst_rows = x_dst_ref[pl.ds(row0, _SUB), :]
        # empty segments (sentinel survived) -> maxes = 0 (torch_scatter fill)
        maxes_ref[pl.ds(row0, _SUB), :] = jnp.where(
            seg_min < _BIG_THRESH, x_dst_rows - seg_min, 0.0)
        return carry

    lax.fori_loop(0, td // _SUB, sub_body, 0)

    x_dst = x_dst_ref[...]
    maxes = maxes_ref[...]
    h = jnp.dot(x_dst, w1_ref[...], preferred_element_type=jnp.float32)
    h = h + jnp.dot(maxes, w2_ref[...], preferred_element_type=jnp.float32)
    h = h + b_ref[...]
    h = jnp.where(h > 0, h, LEAKY_SLOPE * h)
    o_ref[...] = x_dst + h


def bipartite_res_mr_conv(x_dst, gathered, seg, w1, w2, b, td):
    n_dst_pad, wp = x_dst.shape
    e_pad = gathered.shape[0]
    assert n_dst_pad % td == 0 and td % _SUB == 0

    grid_spec = pltpu.PrefetchScalarGridSpec(
        num_scalar_prefetch=1,                 # seg (sorted-edge offsets) -> SMEM
        grid=(n_dst_pad // td,),
        in_specs=[
            pl.BlockSpec((e_pad, wp), lambda i, seg: (0, 0)),   # gathered rows
            pl.BlockSpec((td, wp), lambda i, seg: (i, 0)),      # x_dst tile
            pl.BlockSpec((wp, wp), lambda i, seg: (0, 0)),      # W (x_dst half)
            pl.BlockSpec((wp, wp), lambda i, seg: (0, 0)),      # W (maxes half)
            pl.BlockSpec((1, wp), lambda i, seg: (0, 0)),       # bias
        ],
        out_specs=pl.BlockSpec((td, wp), lambda i, seg: (i, 0)),
        scratch_shapes=[pltpu.VMEM((td, wp), jnp.float32)],     # maxes tile
    )
    return pl.pallas_call(
        _conv_kernel,
        out_shape=jax.ShapeDtypeStruct((n_dst_pad, wp), jnp.float32),
        grid_spec=grid_spec,
        compiler_params=pltpu.CompilerParams(
            dimension_semantics=("parallel",),
            vmem_limit_bytes=_vmem_limit_bytes()),
    )(seg, gathered, x_dst, w1, w2, b)


# ---------------------------------------------------------------------------
# Host / JAX-side preprocessing and parameter padding
# ---------------------------------------------------------------------------
def _prep_edges(e0, e1, n_dst_pad):
    """Sort edges by destination; return segment offsets + sorted src ids."""
    e0 = e0.astype(jnp.int32)
    e1 = e1.astype(jnp.int32)
    order = jnp.argsort(e1)
    e0s = jnp.take(e0, order)
    e1s = jnp.take(e1, order)
    seg = jnp.searchsorted(
        e1s, jnp.arange(n_dst_pad + 1, dtype=jnp.int32), side="left"
    ).astype(jnp.int32)
    # TODO(synk): for very large dst counts seg (1-D SMEM scalar prefetch,
    # padded to next_pow2 bytes) should be split per destination tile.
    return seg, e0s


def _gather_src_rows(x_src, e0_sorted):
    """Pre-gather source rows per sorted edge; pad so chunk reads stay in-bounds."""
    num_edges = int(e0_sorted.shape[0])
    g = jnp.take(x_src, e0_sorted, axis=0)
    e_pad = _round_up(num_edges + _TE, _SUB)
    return jnp.pad(g, ((0, e_pad - num_edges), (0, 0)))


def _pad_linear(w, b, wp):
    din, wn = w.shape
    w_p = jnp.zeros((din, wp), jnp.float32).at[:, :wn].set(w)
    b_p = jnp.zeros((1, wp), jnp.float32).at[:, :wn].set(b)
    return w_p, b_p


def _pad_conv_split(w, b, width, wp):
    # w is the pre-transposed concat weight (2*width, width); split it into the
    # x_dst half (W1) and the maxes half (W2), each padded to (wp, wp).
    w1 = jnp.zeros((wp, wp), jnp.float32).at[:width, :width].set(w[:width])
    w2 = jnp.zeros((wp, wp), jnp.float32).at[:width, :width].set(w[width:])
    b_p = jnp.zeros((1, wp), jnp.float32).at[:, :width].set(b)
    return w1, w2, b_p


# ---------------------------------------------------------------------------
# Parameters (deterministic synthetic init); stored unpadded / un-split.
# ---------------------------------------------------------------------------
def init_params(key, v_in, e_in, f_in, width, num_layers):
    keys = jax.random.split(key, 5 + num_layers)

    def lin(k, cin, cout):
        kw, kb = jax.random.split(k)
        w = jax.random.normal(kw, (cin, cout), jnp.float32) * 0.1
        b = jax.random.normal(kb, (1, cout), jnp.float32) * 0.1
        return w, b

    def conv(k):
        return lin(k, 2 * width, width)

    return {
        "embed_v": lin(keys[0], v_in, width),
        "embed_e": lin(keys[1], e_in, width),
        "embed_f": lin(keys[2], f_in, width),
        "v2e": conv(keys[3]),
        "e2f": conv(keys[4]),
        "msg": [conv(keys[5 + i]) for i in range(num_layers)],
    }


def brep_encoder_forward(params, vertices, edges, faces,
                         edge_to_vertex, face_to_edge, face_to_face):
    out_width = params["embed_v"][0].shape[1]
    wp = _round_up(out_width, _LANE)
    n_e, n_f = edges.shape[0], faces.shape[0]

    td_e = _dst_tile(n_e)
    td_f = _dst_tile(n_f)
    ne_pad = _round_up(n_e, td_e)
    nf_pad = _round_up(n_f, td_f)

    # row-pad destination node tables so conv grids divide evenly; padded rows
    # never feed real rows (edge indices only reference real nodes).
    edges_p = jnp.pad(edges, ((0, ne_pad - n_e), (0, 0)))
    faces_p = jnp.pad(faces, ((0, nf_pad - n_f), (0, 0)))

    # lane-dense (128-wide) padded parameters
    wv, bv = _pad_linear(*params["embed_v"], wp)
    we, be = _pad_linear(*params["embed_e"], wp)
    wf, bf = _pad_linear(*params["embed_f"], wp)
    w1_v2e, w2_v2e, b_v2e = _pad_conv_split(*params["v2e"], out_width, wp)
    w1_e2f, w2_e2f, b_e2f = _pad_conv_split(*params["e2f"], out_width, wp)

    x_v = linear_leaky(vertices, wv, bv)      # (n_v,    wp)
    x_e = linear_leaky(edges_p, we, be)       # (ne_pad, wp)
    x_f = linear_leaky(faces_p, wf, bf)       # (nf_pad, wp)

    # V2E uses edge_to_vertex[[1,0]] -> e[0]=vertex (src), e[1]=edge (dst)
    seg_e, src_e = _prep_edges(edge_to_vertex[1], edge_to_vertex[0], ne_pad)
    x_e = bipartite_res_mr_conv(x_e, _gather_src_rows(x_v, src_e), seg_e,
                                w1_v2e, w2_v2e, b_v2e, td_e)

    # E2F uses face_to_edge[[1,0]] -> e[0]=edge (src), e[1]=face (dst)
    seg_f, src_f = _prep_edges(face_to_edge[1], face_to_edge[0], nf_pad)
    x_f = bipartite_res_mr_conv(x_f, _gather_src_rows(x_e, src_f), seg_f,
                                w1_e2f, w2_e2f, b_e2f, td_f)

    # face-to-face message layers: layer(x_f, x_f, face_to_face[:2]); the
    # gather is redone per layer from the freshly updated x_f.
    seg_ff, src_ff = _prep_edges(face_to_face[0], face_to_face[1], nf_pad)
    for (w, b) in params["msg"]:
        w1, w2, bp = _pad_conv_split(w, b, out_width, wp)
        x_f = bipartite_res_mr_conv(x_f, _gather_src_rows(x_f, src_ff),
                                    seg_ff, w1, w2, bp, td_f)

    return x_f[:n_f, :out_width]


# ---------------------------------------------------------------------------
# Pure-JAX reference (for correctness check)
# ---------------------------------------------------------------------------
def _ref_linear_leaky(x, w, b):
    h = x @ w + b
    return jnp.where(h > 0, h, LEAKY_SLOPE * h)


def _ref_conv(x_src, x_dst, e0, e1, w, b):
    diffs = x_dst[e1] - x_src[e0]
    n = x_dst.shape[0]
    maxes = jnp.full((n, x_dst.shape[1]), -jnp.inf, jnp.float32).at[e1].max(diffs)
    has = jnp.zeros((n,), bool).at[e1].set(True)
    maxes = jnp.where(has[:, None], maxes, 0.0)
    h = jnp.concatenate([x_dst, maxes], axis=1) @ w + b
    return x_dst + jnp.where(h > 0, h, LEAKY_SLOPE * h)


def _ref_forward(params, vertices, edges, faces,
                 edge_to_vertex, face_to_edge, face_to_face):
    x_v = _ref_linear_leaky(vertices, *params["embed_v"])
    x_e = _ref_linear_leaky(edges, *params["embed_e"])
    x_f = _ref_linear_leaky(faces, *params["embed_f"])
    x_e = _ref_conv(x_v, x_e, edge_to_vertex[1], edge_to_vertex[0],
                    *params["v2e"])
    x_f = _ref_conv(x_e, x_f, face_to_edge[1], face_to_edge[0],
                    *params["e2f"])
    for (w, b) in params["msg"]:
        x_f = _ref_conv(x_f, x_f, face_to_face[0], face_to_face[1], w, b)
    return x_f


if __name__ == "__main__":
    key = jax.random.PRNGKey(0)
    k_param, k_v, k_e, k_f, k_ev, k_fe, k_ff = jax.random.split(key, 7)

    # small, self-consistent B-Rep graph
    n_v, n_e, n_f = 8, 12, 6
    v_in, e_in, f_in = 3, 6, 7
    out_width, num_layers = 32, 2

    vertices = jax.random.normal(k_v, (n_v, v_in), jnp.float32)
    edges = jax.random.normal(k_e, (n_e, e_in), jnp.float32)
    faces = jax.random.normal(k_f, (n_f, f_in), jnp.float32)

    # edge_to_vertex: row0 = edge idx, row1 = vertex idx  (2 vertices per edge)
    edge_to_vertex = jnp.stack([
        jnp.repeat(jnp.arange(n_e, dtype=jnp.int32), 2),
        jax.random.randint(k_ev, (2 * n_e,), 0, n_v, jnp.int32),
    ])
    # face_to_edge: row0 = face idx, row1 = edge idx  (3 edges per face)
    face_to_edge = jnp.stack([
        jnp.repeat(jnp.arange(n_f, dtype=jnp.int32), 3),
        jax.random.randint(k_fe, (3 * n_f,), 0, n_e, jnp.int32),
    ])
    # face_to_face adjacency
    face_to_face = jax.random.randint(k_ff, (2, 14), 0, n_f, jnp.int32)

    params = init_params(k_param, v_in, e_in, f_in, out_width, num_layers)

    out = brep_encoder_forward(params, vertices, edges, faces,
                               edge_to_vertex, face_to_edge, face_to_face)
    out = jax.block_until_ready(out)

    ref = _ref_forward(params, vertices, edges, faces,
                       edge_to_vertex, face_to_edge, face_to_face)
    np.testing.assert_allclose(np.asarray(out), np.asarray(ref),
                               rtol=1e-5, atol=1e-5)
    print("KERNEL_OK")
</pallas_src>

<mosaic_0001>
module attributes {stable_mosaic.version = 11 : i64} {
  func.func @_linear_leaky_kernel(%arg0: i32, %arg1: memref<8x3xf32, #tpu.memory_space<vmem>>, %arg2: memref<3x128xf32, #tpu.memory_space<vmem>>, %arg3: memref<1x128xf32, #tpu.memory_space<vmem>>, %arg4: memref<8x128xf32, #tpu.memory_space<vmem>>) attributes {dimension_semantics = [#tpu.dimension_semantics<parallel>], iteration_bounds = array<i64: 1>, scalar_prefetch = 0 : i64, scratch_operands = 0 : i64, tpu.core_type = #tpu.core_type<tc>, window_params = [{transform_indices = @transform_0, window_bounds = array<i64: 8, 3>}, {pipeline_mode = #tpu.pipeline_mode<synchronous>, transform_indices = @transform_1, window_bounds = array<i64: 3, 128>}, {pipeline_mode = #tpu.pipeline_mode<synchronous>, transform_indices = @transform_2, window_bounds = array<i64: 1, 128>}, {transform_indices = @transform_3, window_bounds = array<i64: 8, 128>}]} {
    %c0 = arith.constant 0 : index
    %c0_0 = arith.constant 0 : index
    %0 = vector.load %arg1[%c0, %c0_0] : memref<8x3xf32, #tpu.memory_space<vmem>>, vector<8x3xf32>
    %c0_1 = arith.constant 0 : index
    %c0_2 = arith.constant 0 : index
    %1 = vector.load %arg2[%c0_1, %c0_2] : memref<3x128xf32, #tpu.memory_space<vmem>>, vector<3x128xf32>
    %cst = arith.constant dense<0.000000e+00> : vector<8x128xf32>
    %2 = tpu.matmul %0, %1, %cst {dimension_numbers = #tpu.dot_dimension_numbers<[1], [0], [0], [1], [0, 0, 1, 1], [], []>} : vector<8x3xf32>, vector<3x128xf32>, vector<8x128xf32> -> vector<8x128xf32>
    %c0_3 = arith.constant 0 : index
    %c0_4 = arith.constant 0 : index
    %3 = vector.load %arg3[%c0_3, %c0_4] : memref<1x128xf32, #tpu.memory_space<vmem>>, vector<1x128xf32>
    %4 = vector.broadcast %3 : vector<1x128xf32> to vector<8x128xf32>
    %5 = arith.addf %2, %4 : vector<8x128xf32>
    %cst_5 = arith.constant 0.000000e+00 : f32
    %6 = vector.broadcast %cst_5 : f32 to vector<8x128xf32>
    %7 = arith.cmpf ogt, %5, %6 : vector<8x128xf32>
    %cst_6 = arith.constant 0.00999999977 : f32
    %8 = vector.broadcast %cst_6 : f32 to vector<8x128xf32>
    %9 = arith.mulf %8, %5 : vector<8x128xf32>
    %10 = arith.select %7, %5, %9 : vector<8x128xi1>, vector<8x128xf32>
    %c0_7 = arith.constant 0 : index
    %c0_8 = arith.constant 0 : index
    %11 = vector.load %arg4[%c0_7, %c0_8] : memref<8x128xf32, #tpu.memory_space<vmem>>, vector<8x128xf32>
    tpu.vector_store %arg4[%c0_7, %c0_8], %10 {strides = array<i32>} : memref<8x128xf32, #tpu.memory_space<vmem>>, vector<8x128xf32>,
    return
  }
  func.func @transform_0(%arg0: i32) -> (i32, i32) {
    %c0_i32 = arith.constant 0 : i32
    %c0_i32_0 = arith.constant 0 : i32
    return %arg0, %c0_i32 : i32, i32
  }
  func.func @transform_1(%arg0: i32) -> (i32, i32) {
    %c0_i32 = arith.constant 0 : i32
    %c0_i32_0 = arith.constant 0 : i32
    %c0_i32_1 = arith.constant 0 : i32
    return %c0_i32, %c0_i32_0 : i32, i32
  }
  func.func @transform_2(%arg0: i32) -> (i32, i32) {
    %c0_i32 = arith.constant 0 : i32
    %c0_i32_0 = arith.constant 0 : i32
    %c0_i32_1 = arith.constant 0 : i32
    return %c0_i32, %c0_i32_0 : i32, i32
  }
  func.func @transform_3(%arg0: i32) -> (i32, i32) {
    %c0_i32 = arith.constant 0 : i32
    %c0_i32_0 = arith.constant 0 : i32
    return %arg0, %c0_i32 : i32, i32
  }
}

</mosaic_0001>

<bundles_post_ra>
// kernel: tpu_custom_call.1
= control target key start
LH: loop header
LB: loop body
LE: loop exit
PB: predicated region body
PF: predicated region fallthrough
CT: control target
= control target key end

     0   :  { %vm25_vm0 = vcmask 1042432   ;;  %vm21_vm1 = vcmask 23552   ;;  %s132_s0 = inlined_call_operand.vmem [shape: f32[8,3], index: 0, kind: input, shape index: {}]   ;;  %s133_s1 = inlined_call_operand.vmem [shape: f32[3,128], index: 1, kind: input, shape index: {}]   ;;  %s134_s2 = inlined_call_operand.vmem [shape: f32[1,128], index: 2, kind: input, shape index: {}]   ;;  %s135_s3 = inlined_call_operand.hbm [shape: f32[8,128], index: 3, kind: output, shape index: {}]  }
   0x1   :  { %v16_v0 = vld [vmem:[%s133_s1] sm:$0x7] }
   0x2   :  { %v15_v1 = vld [vmem:[%s132_s0] sm:$0xff]  ;;  %69 = vmatpush.msk.msra.mxu0 %vm25_vm0, %v16_v0 }
   0x3   :  { %8 = vsyncpa [#allocation3], 0  ;;  %70 = vmatmul.msk.f32.vlgmr.msra.gmra.mxu0 %vm21_vm1, %v15_v1  ;;  %v72_v2 = vld [vmem:[%s134_s2] ss:$0 sm:$0xff]  ;;  %s99_s18 = smov [#allocation2]   ;;  %s60_s1 = sshll.u32 %s135_s3, 4  ;;  %s61_s1 = int_to_ptr.hbm [resolvable:$true] %s60_s1 }
   0x4   :  { %s58_s19 = sshll.u32 %s99_s18, 4  ;;  %s59_s19 = int_to_ptr.vmem [resolvable:$true] %s58_s19 }
  0x80   :  { %v46_v3 = vpop.f32.mrf.mxu0 }
  0x81   :  { %v47_v4 = vadd.f32 %v72_v2, %v46_v3 }
  0x83   :  { %vm49_vm2 = vcmp.gt.f32.partialorder %v47_v4, 0.0  ;;  %v50_v5 = vmul.f32 0.01, %v47_v4 }
  0x85   :  { %v51_v6 = vsel %vm49_vm2, %v47_v4, %v50_v5 }
  0x86   :  { %52 = vst [vmem:[#allocation2] sm:$0xff] %v51_v6 }
  0x87   :  { %63 = dma.vmem_to_hbm [thread:$0]  %s59_s19, 128, %s61_s1, [#allocation3]  }
  0x88   :  { %97 = dma.done.wait [#allocation3], 128  }
  0x89   :  { %98 = vsyncadd [#allocation3], 4294967168 }
  0x8a   :  { %68 = vsyncpa [#allocation3], 1 }

</bundles_post_ra>
